<compile_context>
chip_gen: v5e
topology: v5e:2x2
jax: 0.10.0
libtpu: 0.0.40
codegen_flags: <defaults>
</compile_context>

<pallas_src>
import functools

import jax
import jax.numpy as jnp
from jax.experimental import pallas as pl
from jax.experimental.pallas import tpu as pltpu


def _round_up(n, m):
    return ((n + m - 1) // m) * m


def _cdiv(a, b):
    return -(-a // b)


# ----------------------------------------------------------------------------
# Kernel
# ----------------------------------------------------------------------------
def rainbow_kernel(action_dim, num_atoms,
                   x_ref, wb_ref, bb_ref, wq_ref, bq_ref, s_ref,
                   prob_ref, logp_ref):
    # ---- body: phi = relu(x @ W_body + b_body) ------------------------------
    phi = jnp.dot(x_ref[...], wb_ref[...], preferred_element_type=jnp.float32)
    phi = jnp.maximum(phi + bb_ref[...], 0.0)

    # ---- fused dueling head: q = phi @ W_q + b_q ----------------------------
    # (TB, A*N), row-major over (action, atom) -- same layout as the PyTorch
    # .view(-1, A, N).  The dueling combine is already folded into W_q / b_q.
    q = jnp.dot(phi.astype(wq_ref.dtype), wq_ref[...],
                preferred_element_type=jnp.float32) + bq_ref[...]

    # ---- segmented (per-action) softmax / log_softmax over atoms ------------
    if action_dim == 1:
        # Single segment: plain row max.
        seg_max = jnp.max(q, axis=-1, keepdims=True)
    else:
        # Per-segment max for numerical stability: comparison masks only
        # (no lane slicing, no integer vector division).
        lane = jax.lax.broadcasted_iota(jnp.int32, q.shape, 1)
        seg_max = jnp.zeros_like(q)
        for a in range(action_dim):
            mask = (lane >= a * num_atoms) & (lane < (a + 1) * num_atoms)
            m_a = jnp.max(jnp.where(mask, q, -jnp.inf), axis=-1, keepdims=True)
            seg_max = jnp.where(mask, m_a, seg_max)

    qs = q - seg_max                 # <= 0 everywhere (finite)
    e = jnp.exp(qs)                  # single EUP pass over the whole tile

    # Block-diagonal ones matrix: one small MXU matmul both sums exp within
    # each action segment and broadcasts the sum back across its atoms.
    seg_sum = jnp.dot(e, s_ref[...], preferred_element_type=jnp.float32)

    inv = pl.reciprocal(seg_sum, approx=True)    # EUP slot (nearly free)
    inv = inv * (2.0 - seg_sum * inv)            # Newton step 1
    inv = inv * (2.0 - seg_sum * inv)            # Newton step 2 -> f32 exact

    prob_ref[...] = e * inv                      # one full-block store
    logp_ref[...] = qs - jnp.log(seg_sum)        # one full-block store


# ----------------------------------------------------------------------------
# Parameter handling
# ----------------------------------------------------------------------------
def init_params(key, state_dim, hidden, action_dim, num_atoms):
    k1, k2, k3 = jax.random.split(key, 3)
    # layer_init: small-scale weights, zero biases (deterministic synthetic init)
    w_body = jax.random.normal(k1, (state_dim, hidden), jnp.float32) * (1.0 / jnp.sqrt(state_dim))
    b_body = jnp.zeros((1, hidden), jnp.float32)
    w_val = jax.random.normal(k2, (hidden, num_atoms), jnp.float32) * 1e-2
    b_val = jnp.zeros((1, num_atoms), jnp.float32)
    w_adv = jax.random.normal(k3, (hidden, action_dim * num_atoms), jnp.float32) * 1e-2
    b_adv = jnp.zeros((1, action_dim * num_atoms), jnp.float32)
    return dict(w_body=w_body, b_body=b_body, w_val=w_val, b_val=b_val,
                w_adv=w_adv, b_adv=b_adv)


def pack_params(params, *, action_dim, num_atoms, use_bf16=False):
    """One-time packing (call once, outside the hot path).

    Fuses the two head matmuls AND the dueling combine into a single
    (hidden, A*N) weight via the exact linear identity
        q[:, a*N+k] = value[:, k] + adv[:, a*N+k] - mean_a' adv[:, a'*N+k].
    Also builds the block-diagonal segment-sum matrix used by the kernel.
    """
    n, an = num_atoms, action_dim * num_atoms
    w_head = jnp.concatenate([params["w_val"], params["w_adv"]], axis=1)   # (H, n+an)
    b_head = jnp.concatenate([params["b_val"], params["b_adv"]], axis=1)   # (1, n+an)

    eye_n = jnp.eye(n, dtype=jnp.float32)
    m_val = jnp.tile(eye_n, (1, action_dim))                               # (n, an)
    m_adv = (jnp.eye(an, dtype=jnp.float32)
             - jnp.tile(eye_n, (action_dim, action_dim)) / action_dim)     # (an, an)
    m = jnp.concatenate([m_val, m_adv], axis=0)                            # (n+an, an)

    seg_sum_mat = jnp.kron(jnp.eye(action_dim, dtype=jnp.float32),
                           jnp.ones((n, n), jnp.float32))                  # (an, an)

    w_body, w_q = params["w_body"], w_head @ m
    if use_bf16:  # bf16 matmul operands (v6e/v7x MXU native); softmax stays f32
        w_body, w_q = w_body.astype(jnp.bfloat16), w_q.astype(jnp.bfloat16)

    return dict(w_body=w_body, b_body=params["b_body"],
                w_q=w_q, b_q=b_head @ m, seg_sum_mat=seg_sum_mat)


# ----------------------------------------------------------------------------
# Forward wrapper
# ----------------------------------------------------------------------------
def rainbow_forward(x, packed, *, action_dim, num_atoms, block_b=512):
    B, D = x.shape
    an = action_dim * num_atoms
    wb, bb, wq, bq, S = (packed["w_body"], packed["b_body"],
                         packed["w_q"], packed["b_q"], packed["seg_sum_mat"])
    if wb.dtype == jnp.bfloat16:
        x = x.astype(jnp.bfloat16)

    # Batch tiling: pick the tile size that gives cdiv(B, block_b) grid steps
    # with minimal padding (<= 7 pad rows per step) instead of rounding the
    # whole batch up to a multiple of block_b.
    n_blocks = max(1, _cdiv(B, block_b))
    tb = _round_up(_cdiv(B, n_blocks), 8)
    b_pad = tb * n_blocks
    if b_pad != B:
        x = jnp.pad(x, ((0, b_pad - B), (0, 0)))

    kernel = functools.partial(rainbow_kernel, action_dim, num_atoms)
    grid_spec = pltpu.PrefetchScalarGridSpec(
        num_scalar_prefetch=0,
        grid=(n_blocks,),
        in_specs=[
            pl.BlockSpec((tb, D), lambda i: (i, 0)),       # x: tiled over batch
            pl.BlockSpec(wb.shape, lambda i: (0, 0)),      # weights stay resident
            pl.BlockSpec(bb.shape, lambda i: (0, 0)),
            pl.BlockSpec(wq.shape, lambda i: (0, 0)),
            pl.BlockSpec(bq.shape, lambda i: (0, 0)),
            pl.BlockSpec(S.shape, lambda i: (0, 0)),
        ],
        out_specs=(pl.BlockSpec((tb, an), lambda i: (i, 0)),
                   pl.BlockSpec((tb, an), lambda i: (i, 0))),
    )

    prob2d, logp2d = pl.pallas_call(
        kernel,
        out_shape=(jax.ShapeDtypeStruct((b_pad, an), jnp.float32),
                   jax.ShapeDtypeStruct((b_pad, an), jnp.float32)),
        grid_spec=grid_spec,
        compiler_params=pltpu.CompilerParams(
            dimension_semantics=("parallel",)),   # megacore split on v7x
    )(x, wb, bb, wq, bq, S)

    prob = prob2d[:B].reshape(B, action_dim, num_atoms)
    log_prob = logp2d[:B].reshape(B, action_dim, num_atoms)
    return dict(prob=prob, log_prob=log_prob)


# ----------------------------------------------------------------------------
# Pure-JAX reference (mirrors the PyTorch forward exactly)
# ----------------------------------------------------------------------------
def rainbow_forward_ref(x, params, *, action_dim, num_atoms):
    phi = jnp.maximum(x @ params["w_body"] + params["b_body"], 0.0)
    value = (phi @ params["w_val"] + params["b_val"]).reshape(-1, 1, num_atoms)
    adv = (phi @ params["w_adv"] + params["b_adv"]).reshape(-1, action_dim, num_atoms)
    q = value + (adv - adv.mean(axis=1, keepdims=True))
    return dict(prob=jax.nn.softmax(q, axis=-1), log_prob=jax.nn.log_softmax(q, axis=-1))


if __name__ == "__main__":
    B, STATE_DIM, HIDDEN = 8, 16, 32
    ACTION_DIM, NUM_ATOMS = 4, 8

    key = jax.random.PRNGKey(0)
    kx, kp = jax.random.split(key)
    x = jax.random.normal(kx, (B, STATE_DIM), jnp.float32)
    params = init_params(kp, STATE_DIM, HIDDEN, ACTION_DIM, NUM_ATOMS)
    packed = pack_params(params, action_dim=ACTION_DIM, num_atoms=NUM_ATOMS)

    out = rainbow_forward(x, packed, action_dim=ACTION_DIM, num_atoms=NUM_ATOMS)
    jax.block_until_ready(out)

    ref = rainbow_forward_ref(x, params, action_dim=ACTION_DIM, num_atoms=NUM_ATOMS)
    assert jnp.allclose(out["prob"], ref["prob"], atol=1e-5), "prob mismatch"
    assert jnp.allclose(out["log_prob"], ref["log_prob"], atol=1e-5), "log_prob mismatch"
    assert jnp.allclose(jnp.sum(out["prob"], axis=-1), 1.0, atol=1e-5), "prob not normalized"

    print("KERNEL_OK")
</pallas_src>

<mosaic_0001>
module attributes {stable_mosaic.version = 11 : i64} {
  func.func @rainbow_kernel(%arg0: i32, %arg1: memref<8x16xf32, #tpu.memory_space<vmem>>, %arg2: memref<16x32xf32, #tpu.memory_space<vmem>>, %arg3: memref<1x32xf32, #tpu.memory_space<vmem>>, %arg4: memref<32x32xf32, #tpu.memory_space<vmem>>, %arg5: memref<1x32xf32, #tpu.memory_space<vmem>>, %arg6: memref<32x32xf32, #tpu.memory_space<vmem>>, %arg7: memref<8x32xf32, #tpu.memory_space<vmem>>, %arg8: memref<8x32xf32, #tpu.memory_space<vmem>>) attributes {dimension_semantics = [#tpu.dimension_semantics<parallel>], iteration_bounds = array<i64: 1>, scalar_prefetch = 0 : i64, scratch_operands = 0 : i64, tpu.core_type = #tpu.core_type<tc>, window_params = [{transform_indices = @transform_0, window_bounds = array<i64: 8, 16>}, {pipeline_mode = #tpu.pipeline_mode<synchronous>, transform_indices = @transform_1, window_bounds = array<i64: 16, 32>}, {pipeline_mode = #tpu.pipeline_mode<synchronous>, transform_indices = @transform_2, window_bounds = array<i64: 1, 32>}, {pipeline_mode = #tpu.pipeline_mode<synchronous>, transform_indices = @transform_3, window_bounds = array<i64: 32, 32>}, {pipeline_mode = #tpu.pipeline_mode<synchronous>, transform_indices = @transform_4, window_bounds = array<i64: 1, 32>}, {pipeline_mode = #tpu.pipeline_mode<synchronous>, transform_indices = @transform_5, window_bounds = array<i64: 32, 32>}, {transform_indices = @transform_6, window_bounds = array<i64: 8, 32>}, {transform_indices = @transform_7, window_bounds = array<i64: 8, 32>}]} {
    %c0 = arith.constant 0 : index
    %c0_0 = arith.constant 0 : index
    %0 = vector.load %arg1[%c0, %c0_0] : memref<8x16xf32, #tpu.memory_space<vmem>>, vector<8x16xf32>
    %c0_1 = arith.constant 0 : index
    %c0_2 = arith.constant 0 : index
    %1 = vector.load %arg2[%c0_1, %c0_2] : memref<16x32xf32, #tpu.memory_space<vmem>>, vector<16x32xf32>
    %cst = arith.constant dense<0.000000e+00> : vector<8x32xf32>
    %2 = tpu.matmul %0, %1, %cst {dimension_numbers = #tpu.dot_dimension_numbers<[1], [0], [0], [1], [0, 0, 1, 1], [], []>} : vector<8x16xf32>, vector<16x32xf32>, vector<8x32xf32> -> vector<8x32xf32>
    %c0_3 = arith.constant 0 : index
    %c0_4 = arith.constant 0 : index
    %3 = vector.load %arg3[%c0_3, %c0_4] : memref<1x32xf32, #tpu.memory_space<vmem>>, vector<1x32xf32>
    %4 = vector.broadcast %3 : vector<1x32xf32> to vector<8x32xf32>
    %5 = arith.addf %2, %4 : vector<8x32xf32>
    %cst_5 = arith.constant 0.000000e+00 : f32
    %6 = vector.broadcast %cst_5 : f32 to vector<8x32xf32>
    %7 = arith.maximumf %5, %6 : vector<8x32xf32>
    %c0_6 = arith.constant 0 : index
    %c0_7 = arith.constant 0 : index
    %8 = vector.load %arg4[%c0_6, %c0_7] : memref<32x32xf32, #tpu.memory_space<vmem>>, vector<32x32xf32>
    %cst_8 = arith.constant dense<0.000000e+00> : vector<8x32xf32>
    %9 = tpu.matmul %7, %8, %cst_8 {dimension_numbers = #tpu.dot_dimension_numbers<[1], [0], [0], [1], [0, 0, 1, 1], [], []>} : vector<8x32xf32>, vector<32x32xf32>, vector<8x32xf32> -> vector<8x32xf32>
    %c0_9 = arith.constant 0 : index
    %c0_10 = arith.constant 0 : index
    %10 = vector.load %arg5[%c0_9, %c0_10] : memref<1x32xf32, #tpu.memory_space<vmem>>, vector<1x32xf32>
    %11 = vector.broadcast %10 : vector<1x32xf32> to vector<8x32xf32>
    %12 = arith.addf %9, %11 : vector<8x32xf32>
    %13 = tpu.iota {dimensions = array<i32: 1>} : vector<8x32xi32>
    %cst_11 = arith.constant 0.000000e+00 : f32
    %14 = vector.broadcast %cst_11 : f32 to vector<8x32xf32>
    %c0_i32 = arith.constant 0 : i32
    %15 = vector.broadcast %c0_i32 : i32 to vector<8x32xi32>
    %16 = arith.cmpi sge, %13, %15 : vector<8x32xi32>
    %c8_i32 = arith.constant 8 : i32
    %17 = vector.broadcast %c8_i32 : i32 to vector<8x32xi32>
    %18 = arith.cmpi slt, %13, %17 : vector<8x32xi32>
    %19 = arith.andi %16, %18 : vector<8x32xi1>
    %cst_12 = arith.constant 0xFF800000 : f32
    %20 = vector.broadcast %cst_12 : f32 to vector<8x32xf32>
    %21 = arith.select %19, %12, %20 : vector<8x32xi1>, vector<8x32xf32>
    %cst_13 = arith.constant dense<0xFF800000> : vector<8xf32>
    %22 = vector.multi_reduction <maximumf>, %21, %cst_13 [1] : vector<8x32xf32> to vector<8xf32>
    %23 = vector.shape_cast %22 : vector<8xf32> to vector<8x1xf32>
    %24 = vector.shape_cast %23 : vector<8x1xf32> to vector<8x1xf32>
    %25 = vector.broadcast %24 : vector<8x1xf32> to vector<8x32xf32>
    %26 = arith.select %19, %25, %14 : vector<8x32xi1>, vector<8x32xf32>
    %c8_i32_14 = arith.constant 8 : i32
    %27 = vector.broadcast %c8_i32_14 : i32 to vector<8x32xi32>
    %28 = arith.cmpi sge, %13, %27 : vector<8x32xi32>
    %c16_i32 = arith.constant 16 : i32
    %29 = vector.broadcast %c16_i32 : i32 to vector<8x32xi32>
    %30 = arith.cmpi slt, %13, %29 : vector<8x32xi32>
    %31 = arith.andi %28, %30 : vector<8x32xi1>
    %cst_15 = arith.constant 0xFF800000 : f32
    %32 = vector.broadcast %cst_15 : f32 to vector<8x32xf32>
    %33 = arith.select %31, %12, %32 : vector<8x32xi1>, vector<8x32xf32>
    %cst_16 = arith.constant dense<0xFF800000> : vector<8xf32>
    %34 = vector.multi_reduction <maximumf>, %33, %cst_16 [1] : vector<8x32xf32> to vector<8xf32>
    %35 = vector.shape_cast %34 : vector<8xf32> to vector<8x1xf32>
    %36 = vector.shape_cast %35 : vector<8x1xf32> to vector<8x1xf32>
    %37 = vector.broadcast %36 : vector<8x1xf32> to vector<8x32xf32>
    %38 = arith.select %31, %37, %26 : vector<8x32xi1>, vector<8x32xf32>
    %c16_i32_17 = arith.constant 16 : i32
    %39 = vector.broadcast %c16_i32_17 : i32 to vector<8x32xi32>
    %40 = arith.cmpi sge, %13, %39 : vector<8x32xi32>
    %c24_i32 = arith.constant 24 : i32
    %41 = vector.broadcast %c24_i32 : i32 to vector<8x32xi32>
    %42 = arith.cmpi slt, %13, %41 : vector<8x32xi32>
    %43 = arith.andi %40, %42 : vector<8x32xi1>
    %cst_18 = arith.constant 0xFF800000 : f32
    %44 = vector.broadcast %cst_18 : f32 to vector<8x32xf32>
    %45 = arith.select %43, %12, %44 : vector<8x32xi1>, vector<8x32xf32>
    %cst_19 = arith.constant dense<0xFF800000> : vector<8xf32>
    %46 = vector.multi_reduction <maximumf>, %45, %cst_19 [1] : vector<8x32xf32> to vector<8xf32>
    %47 = vector.shape_cast %46 : vector<8xf32> to vector<8x1xf32>
    %48 = vector.shape_cast %47 : vector<8x1xf32> to vector<8x1xf32>
    %49 = vector.broadcast %48 : vector<8x1xf32> to vector<8x32xf32>
    %50 = arith.select %43, %49, %38 : vector<8x32xi1>, vector<8x32xf32>
    %c24_i32_20 = arith.constant 24 : i32
    %51 = vector.broadcast %c24_i32_20 : i32 to vector<8x32xi32>
    %52 = arith.cmpi sge, %13, %51 : vector<8x32xi32>
    %c32_i32 = arith.constant 32 : i32
    %53 = vector.broadcast %c32_i32 : i32 to vector<8x32xi32>
    %54 = arith.cmpi slt, %13, %53 : vector<8x32xi32>
    %55 = arith.andi %52, %54 : vector<8x32xi1>
    %cst_21 = arith.constant 0xFF800000 : f32
    %56 = vector.broadcast %cst_21 : f32 to vector<8x32xf32>
    %57 = arith.select %55, %12, %56 : vector<8x32xi1>, vector<8x32xf32>
    %cst_22 = arith.constant dense<0xFF800000> : vector<8xf32>
    %58 = vector.multi_reduction <maximumf>, %57, %cst_22 [1] : vector<8x32xf32> to vector<8xf32>
    %59 = vector.shape_cast %58 : vector<8xf32> to vector<8x1xf32>
    %60 = vector.shape_cast %59 : vector<8x1xf32> to vector<8x1xf32>
    %61 = vector.broadcast %60 : vector<8x1xf32> to vector<8x32xf32>
    %62 = arith.select %55, %61, %50 : vector<8x32xi1>, vector<8x32xf32>
    %63 = arith.subf %12, %62 : vector<8x32xf32>
    %64 = math.exp %63 : vector<8x32xf32>
    %c0_23 = arith.constant 0 : index
    %c0_24 = arith.constant 0 : index
    %65 = vector.load %arg6[%c0_23, %c0_24] : memref<32x32xf32, #tpu.memory_space<vmem>>, vector<32x32xf32>
    %cst_25 = arith.constant dense<0.000000e+00> : vector<8x32xf32>
    %66 = tpu.matmul %64, %65, %cst_25 {dimension_numbers = #tpu.dot_dimension_numbers<[1], [0], [0], [1], [0, 0, 1, 1], [], []>} : vector<8x32xf32>, vector<32x32xf32>, vector<8x32xf32> -> vector<8x32xf32>
    %67 = tpu.reciprocal %66 {approx = true} : vector<8x32xf32> -> vector<8x32xf32>
    %68 = arith.mulf %66, %67 : vector<8x32xf32>
    %cst_26 = arith.constant 2.000000e+00 : f32
    %69 = vector.broadcast %cst_26 : f32 to vector<8x32xf32>
    %70 = arith.subf %69, %68 : vector<8x32xf32>
    %71 = arith.mulf %67, %70 : vector<8x32xf32>
    %72 = arith.mulf %66, %71 : vector<8x32xf32>
    %cst_27 = arith.constant 2.000000e+00 : f32
    %73 = vector.broadcast %cst_27 : f32 to vector<8x32xf32>
    %74 = arith.subf %73, %72 : vector<8x32xf32>
    %75 = arith.mulf %71, %74 : vector<8x32xf32>
    %76 = arith.mulf %64, %75 : vector<8x32xf32>
    %c0_28 = arith.constant 0 : index
    %c0_29 = arith.constant 0 : index
    %77 = vector.load %arg7[%c0_28, %c0_29] : memref<8x32xf32, #tpu.memory_space<vmem>>, vector<8x32xf32>
    tpu.vector_store %arg7[%c0_28, %c0_29], %76 {strides = array<i32>} : memref<8x32xf32, #tpu.memory_space<vmem>>, vector<8x32xf32>,
    %78 = math.log %66 : vector<8x32xf32>
    %79 = arith.subf %63, %78 : vector<8x32xf32>
    %c0_30 = arith.constant 0 : index
    %c0_31 = arith.constant 0 : index
    %80 = vector.load %arg8[%c0_30, %c0_31] : memref<8x32xf32, #tpu.memory_space<vmem>>, vector<8x32xf32>
    tpu.vector_store %arg8[%c0_30, %c0_31], %79 {strides = array<i32>} : memref<8x32xf32, #tpu.memory_space<vmem>>, vector<8x32xf32>,
    return
  }
  func.func @transform_0(%arg0: i32) -> (i32, i32) {
    %c0_i32 = arith.constant 0 : i32
    %c0_i32_0 = arith.constant 0 : i32
    return %arg0, %c0_i32 : i32, i32
  }
  func.func @transform_1(%arg0: i32) -> (i32, i32) {
    %c0_i32 = arith.constant 0 : i32
    %c0_i32_0 = arith.constant 0 : i32
    %c0_i32_1 = arith.constant 0 : i32
    return %c0_i32, %c0_i32_0 : i32, i32
  }
  func.func @transform_2(%arg0: i32) -> (i32, i32) {
    %c0_i32 = arith.constant 0 : i32
    %c0_i32_0 = arith.constant 0 : i32
    %c0_i32_1 = arith.constant 0 : i32
    return %c0_i32, %c0_i32_0 : i32, i32
  }
  func.func @transform_3(%arg0: i32) -> (i32, i32) {
    %c0_i32 = arith.constant 0 : i32
    %c0_i32_0 = arith.constant 0 : i32
    %c0_i32_1 = arith.constant 0 : i32
    return %c0_i32, %c0_i32_0 : i32, i32
  }
  func.func @transform_4(%arg0: i32) -> (i32, i32) {
    %c0_i32 = arith.constant 0 : i32
    %c0_i32_0 = arith.constant 0 : i32
    %c0_i32_1 = arith.constant 0 : i32
    return %c0_i32, %c0_i32_0 : i32, i32
  }
  func.func @transform_5(%arg0: i32) -> (i32, i32) {
    %c0_i32 = arith.constant 0 : i32
    %c0_i32_0 = arith.constant 0 : i32
    %c0_i32_1 = arith.constant 0 : i32
    return %c0_i32, %c0_i32_0 : i32, i32
  }
  func.func @transform_6(%arg0: i32) -> (i32, i32) {
    %c0_i32 = arith.constant 0 : i32
    %c0_i32_0 = arith.constant 0 : i32
    return %arg0, %c0_i32 : i32, i32
  }
  func.func @transform_7(%arg0: i32) -> (i32, i32) {
    %c0_i32 = arith.constant 0 : i32
    %c0_i32_0 = arith.constant 0 : i32
    return %arg0, %c0_i32 : i32, i32
  }
}

</mosaic_0001>

<bundles_post_ra>
// kernel: tpu_custom_call.1
= control target key start
LH: loop header
LB: loop body
LE: loop exit
PB: predicated region body
PF: predicated region fallthrough
CT: control target
= control target key end

     0   :  { %13 = vsyncpa [#allocation3], 0  ;;  %s543_s0 = inlined_call_operand.hbm [shape: f32[8,16], index: 0, kind: input, shape index: {}]   ;;  %s544_s1 = inlined_call_operand.hbm [shape: f32[16,32], index: 1, kind: input, shape index: {}]   ;;  %s545_s2 = inlined_call_operand.vmem [shape: f32[1,32], index: 2, kind: input, shape index: {}]   ;;  %s546_s3 = inlined_call_operand.hbm [shape: f32[32,32], index: 3, kind: input, shape index: {}]   ;;  %s547_s4 = inlined_call_operand.vmem [shape: f32[1,32], index: 4, kind: input, shape index: {}]   ;;  %s548_s5 = inlined_call_operand.hbm [shape: f32[32,32], index: 5, kind: input, shape index: {}]   ;;  %s549_s6 = inlined_call_operand.hbm [shape: f32[8,32], index: 6, kind: output, shape index: {0}]   ;;  %s550_s7 = inlined_call_operand.hbm [shape: f32[8,32], index: 7, kind: output, shape index: {1}]  }
   0x1   :  { %14 = vsyncpa [#allocation6], 0 }
   0x2   :  { %15 = vsyncpa [#allocation9], 0 }
   0x3   :  { %16 = vsyncpa [#allocation4], 0  ;;  %s33_s26 = sshll.u32 %s544_s1, 4  ;;  %s34_s26 = int_to_ptr.hbm [resolvable:$true] %s33_s26 }
   0x4   :  { %17 = vsyncpa [#allocation12], 0  ;;  %s437_s27 = smov [#allocation5]   ;;  %s23_s8 = sshll.u32 %s543_s0, 4  ;;  %s24_s8 = int_to_ptr.hbm [resolvable:$true] %s23_s8 }
   0x5   :  { %s35_s28 = sshll.u32 %s437_s27, 4  ;;  %s438_s9 = smov 128   ;;  %s36_s28 = int_to_ptr.vmem [resolvable:$true] %s35_s28 }
   0x6   :  { %s439_s10 = smov 8   ;;  %s440_s11 = smov [#allocation2]  }
   0x7   :  { %41 = dma.hbm_to_vmem [thread:$0]  %s34_s26, 256, %s36_s28, [#allocation6], %s438_s9, %s438_s9, %s439_s10  }
   0x8   :  { %s25_s12 = sshll.u32 %s440_s11, 4  ;;  %s48_s15 = sshll.u32 %s546_s3, 4  ;;  %s26_s12 = int_to_ptr.vmem [resolvable:$true] %s25_s12  ;;  %s49_s15 = int_to_ptr.hbm [resolvable:$true] %s48_s15 }
   0x9   :  { %28 = dma.hbm_to_vmem [thread:$0]  %s24_s8, 128, %s26_s12, [#allocation3]  }
   0xa   :  { %s63_s17 = sshll.u32 %s548_s5, 4  ;;  %s441_s18 = smov [#allocation7]   ;;  %s64_s17 = int_to_ptr.hbm [resolvable:$true] %s63_s17 }
   0xb   :  { %s50_s19 = sshll.u32 %s441_s18, 4  ;;  %s442_s0 = smov [#allocation8]   ;;  %s51_s19 = int_to_ptr.vmem [resolvable:$true] %s50_s19 }
   0xc   :  { %56 = dma.hbm_to_vmem [thread:$0]  %s49_s15, 512, %s51_s19, [#allocation6], %s438_s9, %s438_s9, %s439_s10  }
   0xd   :  { %s65_s20 = sshll.u32 %s442_s0, 4  ;;  %s66_s20 = int_to_ptr.vmem [resolvable:$true] %s65_s20 }
   0xe   :  { %71 = dma.hbm_to_vmem [thread:$0]  %s64_s17, 512, %s66_s20, [#allocation9], %s438_s9, %s438_s9, %s439_s10  }
   0xf   :  { %427 = dma.done.wait [#allocation3], 128  }
  0x10   :  { %428 = vsyncadd [#allocation3], 4294967168 }
  0x11   :  { %429 = dma.done.wait [#allocation6], 768  }
  0x12   :  { %430 = vsyncadd [#allocation6], 4294966528 }
  0x13   :  { %431 = dma.done.wait [#allocation9], 512  }
  0x14   :  { %432 = vsyncadd [#allocation9], 4294966784  ;;  %v90_v0 = vld [vmem:[#allocation5 + $0x8] sm:$0xff]  ;;  %v89_v1 = vld [vmem:[#allocation5] sm:$0xff]  ;;  %vm95_vm0 = vcmask 130048   ;;  %vm128_vm1 = vcmask 261120   ;;  %v152_v11 = vlaneseq }
  0x15   :  { %113 = vmatpush.msra.mxu0 %v90_v0  ;;  %v88_v2 = vld [vmem:[#allocation2] sm:$0xff]  ;;  %v123_v3 = vld [vmem:[#allocation7 + $0x18] sm:$0xff]  ;;  %v122_v4 = vld [vmem:[#allocation7 + $0x10] sm:$0xff]  ;;  %s247_s25 = sshll.u32 %s550_s7, 4  ;;  %s444_s26 = smov [#allocation10]   ;;  %s248_s25 = int_to_ptr.hbm [resolvable:$true] %s247_s25 }
  0x16   :  { %144 = vmatpush.msra.mxu1 %v123_v3  ;;  %v121_v5 = vld [vmem:[#allocation7 + $0x8] sm:$0xff]  ;;  %v120_v6 = vld [vmem:[#allocation7] sm:$0xff]  ;;  %v153_v12 = vand.u32 127, %v152_v11  ;;  %v192_v27 = vld [vmem:[#allocation8 + $0x18] sm:$0xff]  ;;  %s234_s27 = sshll.u32 %s444_s26, 4  ;;  %s236_s30 = sshll.u32 %s549_s6, 4  ;;  %s235_s27 = int_to_ptr.vmem [resolvable:$true] %s234_s27  ;;  %s237_s30 = int_to_ptr.hbm [resolvable:$true] %s236_s30 }
  0x17   :  { %114 = vmatpush.msra.mxu0 %v89_v1  ;;  %v275_v7 = vld [vmem:[%s545_s2] ss:$0 sm:$0xff]  ;;  %208 = vmatpush.msra.mxu2 %v192_v27  ;;  %v191_v28 = vld [vmem:[#allocation8 + $0x10] sm:$0xff]  ;;  %v189_v30 = vld [vmem:[#allocation8] sm:$0xff]  ;;  %s443_s2 = smov [#allocation11]  }
  0x18   :  { %264 = vmatmul.msk.f32.vlgmr.msra.gmra.mxu0 %vm95_vm0, %v88_v2  ;;  %145 = vmatpush.msra.mxu1 %v122_v4  ;;  %v276_v13 = vld [vmem:[%s547_s4] ss:$0 sm:$0xff]  ;;  %vm170_vm2 = vcmp.ge.s32.totalorder %v153_v12, 16  ;;  %vm171_vm3 = vcmp.lt.s32.totalorder %v153_v12, 24  ;;  %vm155_vm5 = vcmp.lt.s32.totalorder %v153_v12, 8  ;;  %vm178_vm6 = vcmp.ge.s32.totalorder %v153_v12, 24 }
  0x19   :  { %vm504_vm4 = vmand %vm170_vm2, %vm171_vm3  ;;  %vm179_vm7 = vcmp.lt.s32.totalorder %v153_v12, 32  ;;  %vm162_vm8 = vcmp.ge.s32.totalorder %v153_v12, 8  ;;  %vm163_vm9 = vcmp.lt.s32.totalorder %v153_v12, 16  ;;  %v190_v29 = vld [vmem:[#allocation8 + $0x8] sm:$0xff]  ;;  %209 = vmatpush.msra.mxu2 %v191_v28  ;;  %s245_s4 = sshll.u32 %s443_s2, 4  ;;  %s246_s4 = int_to_ptr.vmem [resolvable:$true] %s245_s4 }
  0x1a   :  { %146 = vmatpush.msra.mxu1 %v121_v5  ;;  %vm513_vm10 = vmand %vm178_vm6, %vm179_vm7 }
  0x1b   :  { %vm517_vm11 = vmand %vm162_vm8, %vm163_vm9  ;;  %210 = vmatpush.msra.mxu2 %v190_v29 }
  0x1c   :  { %147 = vmatpush.msra.mxu1 %v120_v6 }
  0x1d   :  { %211 = vmatpush.msra.mxu2 %v189_v30 }
  0x95   :  { %v116_v8 = vpop.f32.mrf.mxu0 }
  0x96   :  { %v117_v9 = vadd.f32 %v275_v7, %v116_v8 }
  0x98   :  { %v119_v10 = vmax.f32 %v117_v9, 0.0 }
  0x9a   :  { %265 = vmatmul.msk.f32.vlgmr.msra.gmra.mxu1 %vm128_vm1, %v119_v10 }
 0x117   :  { %v149_v14 = vpop.f32.mrf.mxu1 }
 0x118   :  { %v150_v16 = vadd.f32 %v276_v13, %v149_v14 }
 0x11a   :  { %v173_v17 = vsel %vm504_vm4, %v150_v16, -inf  ;;  %v157_v18 = vsel %vm155_vm5, %v150_v16, -inf  ;;  %v181_v23 = vsel %vm513_vm10, %v150_v16, -inf  ;;  %v165_v24 = vsel %vm517_vm11, %v150_v16, -inf }
 0x11b   :  { %v174_v19 = vsel %vm128_vm1, %v173_v17, -inf  ;;  %v158_v20 = vsel %vm128_vm1, %v157_v18, -inf  ;;  %v182_v25 = vsel %vm128_vm1, %v181_v23, -inf  ;;  %v166_v26 = vsel %vm128_vm1, %v165_v24, -inf }
 0x11c   :  { %175 = vmax.xlane.f32.xlu1 %v174_v19  ;;  %159 = vmax.xlane.f32.xlu0 %v158_v20 }
 0x124   :  { %183 = vmax.xlane.f32.xlu1 %v182_v25  ;;  %167 = vmax.xlane.f32.xlu0 %v166_v26 }
 0x18f   :  { %v176_v31 = vpop.xlane.xlu1 %175  ;;  %v160_v32 = vpop.xlane.xlu0 %159 }
 0x190   :  { %v161_v33 = vsel %vm155_vm5, %v160_v32, 0.0 }
 0x197   :  { %v168_v34 = vpop.xlane.xlu0 %167  ;;  %v184_v36 = vpop.xlane.xlu1 %183 }
 0x198   :  { %v169_v35 = vsel %vm517_vm11, %v168_v34, %v161_v33 }
 0x199   :  { %v177_v37 = vsel %vm504_vm4, %v176_v31, %v169_v35 }
 0x19a   :  { %v185_v38 = vsel %vm513_vm10, %v184_v36, %v177_v37 }
 0x19b   :  { %v186_v39 = vsub.f32 %v150_v16, %v185_v38 }
 0x19d   :  { %v187_v40 = vmul.f32 1.442695, %v186_v39 }
 0x19f   :  { %277 = vpow2.f32 %v187_v40 }
 0x1a5   :  { %v278_v41 = vpop.eup %277 }
 0x1a6   :  { %266 = vmatmul.msk.f32.vlgmr.msra.gmra.mxu2 %vm128_vm1, %v278_v41 }
 0x229   :  { %v213_v42 = vpop.f32.mrf.mxu2 }
 0x22a   :  { %279 = vrcp.f32 %v213_v42 }
 0x22b   :  { %281 = vlog2.f32 %v213_v42 }
 0x230   :  { %v280_v43 = vpop.eup %279 }
 0x231   :  { %v282_v44 = vpop.eup %281  ;;  %v217_v45 = vmul.f32 %v280_v43, %v213_v42 }
 0x232   :  { %v226_v46 = vmul.f32 0.6931472, %v282_v44 }
 0x233   :  { %v218_v47 = vsub.f32 2.0, %v217_v45 }
 0x234   :  { %v227_v48 = vsub.f32 %v186_v39, %v226_v46 }
 0x235   :  { %v219_v49 = vmul.f32 %v280_v43, %v218_v47 }
 0x236   :  { %228 = vst.msk [vmem:[#allocation11] sm:$0xff] %vm128_vm1, %v227_v48 }
 0x237   :  { %v220_v50 = vmul.f32 %v219_v49, %v213_v42  ;;  %250 = dma.vmem_to_hbm [thread:$0]  %s246_s4, 128, %s248_s25, [#allocation12]  }
 0x239   :  { %v221_v51 = vsub.f32 2.0, %v220_v50 }
 0x23b   :  { %v222_v52 = vmul.f32 %v221_v51, %v219_v49 }
 0x23d   :  { %v223_v53 = vmul.f32 %v278_v41, %v222_v52 }
 0x23f   :  { %224 = vst.msk [vmem:[#allocation10] sm:$0xff] %vm128_vm1, %v223_v53 }
 0x240   :  { %239 = dma.vmem_to_hbm [thread:$0]  %s235_s27, 128, %s237_s30, [#allocation4]  }
 0x241   :  { %433 = dma.done.wait [#allocation4], 128  }
 0x242   :  { %434 = vsyncadd [#allocation4], 4294967168 }
 0x243   :  { %435 = dma.done.wait [#allocation12], 128  }
 0x244   :  { %436 = vsyncadd [#allocation12], 4294967168 }
 0x245   :  { %259 = vsyncpa [#allocation3], 1 }
 0x246   :  { %260 = vsyncpa [#allocation6], 1 }
 0x247   :  { %261 = vsyncpa [#allocation9], 1 }
 0x248   :  { %262 = vsyncpa [#allocation4], 1 }
 0x249   :  { %263 = vsyncpa [#allocation12], 1 }

</bundles_post_ra>
